<compile_context>
chip_gen: v7x
topology: tpu7x:2x2x1
jax: 0.10.0
libtpu: 0.0.40
codegen_flags: <defaults>
</compile_context>

<pallas_src>
import jax
import jax.numpy as jnp
from jax.experimental import pallas as pl
from jax.experimental.pallas import tpu as pltpu

_LANES = 128                       # vreg lane width (last dim target)
_TARGET_BLOCK_BYTES = 2 * 1024 * 1024  # ~2 MiB per block -> ~8 MiB pipelined VMEM


def _identity_copy_kernel(x_ref, o_ref):
    # Entire Generator forward pass: o = x.
    o_ref[...] = x_ref[...]


def _sublane_granule(dtype) -> int:
    """Native sublane multiple for lane-dense (sublane, 128) tiles."""
    itemsize = jnp.dtype(dtype).itemsize
    # f32 -> 8, bf16/f16 -> 16, int8/fp8 -> 32
    return max(8, 32 // max(itemsize, 1))


def _pick_tile_m(rows: int, sublane: int, max_rows: int) -> int:
    """Largest tile_m that divides `rows`, is a multiple of `sublane`, is
    <= max_rows, and (when possible) yields an even grid count >= 2."""
    units = rows // sublane
    cap = max(1, min(max_rows // sublane, units))
    if units >= 2:
        # Ensure at least 2 grid steps so v7x's two TensorCores both work.
        cap = max(1, min(cap, units // 2))
    best_any = None
    best_even = None
    for t in range(cap, 0, -1):
        if units % t == 0:
            if best_any is None:
                best_any = t
            if (units // t) % 2 == 0:
                best_even = t
                break
    t = best_even if best_even is not None else (best_any or 1)
    return t * sublane


def generator_forward(x: jax.Array, *, force_pallas: bool = False) -> jax.Array:
    """Generator.forward (identity).

    Default (and optimal) path: hand `x` straight back -- zero HBM traffic,
    zero dispatch cost, for every size. A tiled, lane-dense Pallas copy is
    kept only for framework/testing purposes behind `force_pallas=True`.
    """
    sublane = _sublane_granule(x.dtype)
    lane_granule = sublane * _LANES
    lane_alignable = x.size > 0 and (x.size % lane_granule) == 0

    if not force_pallas or not lane_alignable:
        # TODO(synk): padding to a lane-dense layout is possible but pointless
        # for an identity forward; return the array unchanged (zero-copy).
        return x

    # Lane-dense 2-D presentation: last dim = 128 (unmasked vst), row count a
    # multiple of the dtype's native sublane granule (checked above).
    rows = x.size // _LANES
    x2 = x.reshape(rows, _LANES)

    itemsize = jnp.dtype(x.dtype).itemsize
    max_rows = max(sublane, _TARGET_BLOCK_BYTES // (_LANES * itemsize))
    tile_m = _pick_tile_m(rows, sublane, max_rows)
    grid_m = rows // tile_m  # tile_m divides rows: no masked tail tile

    y2 = pl.pallas_call(
        _identity_copy_kernel,
        out_shape=jax.ShapeDtypeStruct((rows, _LANES), x2.dtype),
        grid=(grid_m,),
        in_specs=[pl.BlockSpec((tile_m, _LANES), lambda i: (i, 0))],
        out_specs=pl.BlockSpec((tile_m, _LANES), lambda i: (i, 0)),
        compiler_params=pltpu.CompilerParams(
            # Shard the row axis across v7x's 2 TensorCores; no-op on v5e/v6e.
            dimension_semantics=("parallel",),
        ),
    )(x2)

    return y2.reshape(x.shape)


if __name__ == "__main__":
    key = jax.random.PRNGKey(0)
    k1, k2, k3 = jax.random.split(key, 3)

    # 1) Shape implied by the PyTorch module: a small noise batch.
    #    Takes the zero-copy fast path (identity is free).
    batch, noise_dim = 8, 32
    x_small = jax.random.normal(k1, (batch, noise_dim), dtype=jnp.float32)
    y_small = generator_forward(x_small)
    jax.block_until_ready(y_small)
    assert y_small.shape == x_small.shape and y_small.dtype == x_small.dtype
    assert bool(jnp.array_equal(y_small, x_small)), "fast-path identity mismatch"

    # 2) A larger f32 batch that exercises the tiled, lane-dense Pallas path
    #    (rows=2048 -> tile_m=1024, grid=2, even -> both v7x TCs busy).
    x_large = jax.random.normal(k2, (1024, 256), dtype=jnp.float32)
    y_large = generator_forward(x_large, force_pallas=True)
    jax.block_until_ready(y_large)
    assert y_large.shape == x_large.shape and y_large.dtype == x_large.dtype
    assert bool(jnp.array_equal(y_large, x_large)), "pallas f32 identity mismatch"

    # 3) bf16 input: dtype-aware 16-row sublane granule keeps the block
    #    native-tile aligned (rows=1024 -> tile_m=512, grid=2).
    x_bf16 = jax.random.normal(k3, (512, 256), dtype=jnp.float32).astype(jnp.bfloat16)
    y_bf16 = generator_forward(x_bf16, force_pallas=True)
    jax.block_until_ready(y_bf16)
    assert y_bf16.shape == x_bf16.shape and y_bf16.dtype == x_bf16.dtype
    assert bool(jnp.array_equal(y_bf16, x_bf16)), "pallas bf16 identity mismatch"

    print("KERNEL_OK")
</pallas_src>

<mosaic_0001>
module attributes {stable_mosaic.version = 11 : i64} {
  func.func @_identity_copy_kernel(%arg0: i32, %arg1: memref<1024x128xf32, #tpu.memory_space<vmem>>, %arg2: memref<1024x128xf32, #tpu.memory_space<vmem>>) attributes {dimension_semantics = [#tpu.dimension_semantics<parallel>], iteration_bounds = array<i64: 2>, scalar_prefetch = 0 : i64, scratch_operands = 0 : i64, tpu.core_type = #tpu.core_type<tc>, window_params = [{transform_indices = @transform_0, window_bounds = array<i64: 1024, 128>}, {transform_indices = @transform_1, window_bounds = array<i64: 1024, 128>}]} {
    %c0 = arith.constant 0 : index
    %c0_0 = arith.constant 0 : index
    %0 = vector.load %arg1[%c0, %c0_0] : memref<1024x128xf32, #tpu.memory_space<vmem>>, vector<1024x128xf32>
    %c0_1 = arith.constant 0 : index
    %c0_2 = arith.constant 0 : index
    %1 = vector.load %arg2[%c0_1, %c0_2] : memref<1024x128xf32, #tpu.memory_space<vmem>>, vector<1024x128xf32>
    tpu.vector_store %arg2[%c0_1, %c0_2], %0 {strides = array<i32>} : memref<1024x128xf32, #tpu.memory_space<vmem>>, vector<1024x128xf32>,
    return
  }
  func.func @transform_0(%arg0: i32) -> (i32, i32) {
    %c0_i32 = arith.constant 0 : i32
    %c0_i32_0 = arith.constant 0 : i32
    return %arg0, %c0_i32 : i32, i32
  }
  func.func @transform_1(%arg0: i32) -> (i32, i32) {
    %c0_i32 = arith.constant 0 : i32
    %c0_i32_0 = arith.constant 0 : i32
    return %arg0, %c0_i32 : i32, i32
  }
}

</mosaic_0001>

<bundles_post_ra>
// kernel: tpu_custom_call.1
= control target key start
LH: loop header
LB: loop body
LE: loop exit
PB: predicated region body
PF: predicated region fallthrough
CT: control target
= control target key end

     0   :  { %6 = vsyncpa [#allocation3], 0  ;;  %s1083_s0 = inlined_call_operand.hbm [shape: f32[2048,128], index: 0, kind: input, shape index: {}]   ;;  %s1084_s1 = inlined_call_operand.hbm [shape: f32[2048,128], index: 1, kind: output, shape index: {}]  }
   0x1   :  { %8 = vsyncpa [#allocation3 + $0x1], 0 }
   0x2   :  { %9 = vsyncpa [#allocation4], 0 }
   0x3   :  { %11 = vsyncpa [#allocation4 + $0x1], 0  ;;  %s660_s6 = smov 0   ;;  %s662_s7 = smov 0  }
   0x4   :  { %s664_s8 = smov 0   ;;  %s666_s9 = smov 0  }
   0x5 LB: > { %s681_s10 = sadd.s32 4294967295, %s642_s9   ;;  %s480_s11 = sadd.s32 4294967294, %s642_s9   ;;  %s642_s9 = sphi %s666_s9, %s1097_s9   ;;  %s638_s8 = sphi %s664_s8, %s1096_s8   ;;  %s634_s7 = sphi %s662_s7, %s1095_s7   ;;  %s630_s6 = sphi %s660_s6, %s1094_s6  }
   0x6   : > { %s685_s12 = sadd.s32 1, %s642_s9   ;;  %s24_s13 = sadd.s32 1, %s638_s8 }
   0x7   : > { %s21_s14 = ssub.s32 %s642_s9, %s685_s12  ;;  %p31_p0 = scmp.ne.s32.totalorder %s638_s8, %s634_s7 }
   0x8   : > { %p22_p1 = scmp.eq.s32.totalorder %s21_s14, 0  ;;  %p32_p2 = scmp.eq.s32.totalorder %s642_s9, 0 }
   0x9   : > { %p37_p3 = scmp.ne.s32.totalorder %s634_s7, %s630_s6  ;;  %p38_p4 = scmp.eq.s32.totalorder %s681_s10, 0 }
   0xa   : > { %s697_s15 = scalar_select %p22_p1, %s638_s8, %s24_s13  }
   0xb   : > { %p699_p5 = por %p32_p2, %p31_p0  ;;  %p703_p6 = por %p38_p4, %p37_p3 }
   0xc   : > { %p61_p7 = scmp.eq.s32.totalorder %s681_s10, 1  ;;  %p67_p8 = scmp.eq.s32.totalorder %s480_s11, 1 }
   0xd   : > { %p508_p10 = scmp.lt.s32.totalorder %s642_s9, 2  ;;  %s87_s20 = sand.u32 1, %s638_s8  }
   0xe   : > { %p710_p11 = por %p61_p7, %p31_p0  ;;  %p714_p12 = por %p67_p8, %p37_p3 }
   0xf   : > { %s494_s21 = sshll.u32 %s642_s9, 14  ;;  %s483_s22 = sshll.u32 %s87_s20, 10 }
  0x10   : > { %s1088_s18 = scalar_select %p710_p11, 1, 0 }
  0x11   : > { %s1089_s19 = scalar_select %p714_p12, 1, 0 }
  0x12   : > { %s723_s25 = scalar_lea.hbm %s1083_s0, %s494_s21  ;;  %s91_s26 = scalar_lea.vmem [#allocation2], %s483_s22 }
  0x13   : > { %s98_s27 = sshll.u32 %s91_s26, 4  ;;  %p727_p13 = pnand %p508_p10, %p699_p5  ;;  %s731_s27 = int_to_ptr.vmem [resolvable:$true] %s98_s27 }
  0x14   : > { %s733_s29 = scalar_lea.sflag [#allocation3], %s87_s20  ;;  %s546_s30 = scalar_lea.hbm %s723_s25, 16384 }
  0x15   : > { %p547_p0 = scmp.ne.s32.totalorder %s723_s25, %s546_s30  ;;  %p548_p1 = pneg %p727_p13 }
  0x16   : > { %s551_s4 = scalar_lea.hbm %s1083_s0, 32768  ;;  %p552_p4 = scmp.lt.u32.totalorder %s723_s25, %s1083_s0 }
  0x17   : > { %p549_p2 = pnand %p548_p1, %p547_p0  ;;  %p553_p5 = scmp.lt.u32.totalorder %s551_s4, %s546_s30 }
  0x18   : > { %p555_p8 = scmp.lt.u32.totalorder %s546_s30, %s723_s25 }
  0x19   : > { %p550_p3 = pneg %p549_p2  ;;  %p554_p7 = por %p553_p5, %p552_p4 }
  0x1b   : > { %p556_p10 = por %p555_p8, %p554_p7 }
  0x1d   : > { %p557_p9 = pnand %p556_p10, %p550_p3 }
  0x1f   : > { %560 = shalt.err (!%p557_p9)
}
  0x20   : > { %s561_s13 = scalar_lea.vmem %s731_s27, 16384  ;;  %s644_s14 = smov [#allocation2]  }
  0x21   : > { %p562_p0 = scmp.ne.s32.totalorder %s731_s27, %s561_s13  ;;  %s566_s16 = sshll.u32 %s644_s14, 4  ;;  %s567_s16 = int_to_ptr.vmem [resolvable:$false] %s566_s16 }
  0x22   : > { %s568_s20 = scalar_lea.vmem %s567_s16, 32768  ;;  %p569_p11 = scmp.lt.s32.totalorder %s731_s27, %s567_s16 }
  0x23   : > { %p564_p2 = pnand %p562_p0, %p548_p1  ;;  %p570_p4 = scmp.lt.s32.totalorder %s568_s20, %s561_s13 }
  0x25   : > { %p565_p12 = pneg %p564_p2  ;;  %p571_p5 = por %p570_p4, %p569_p11 }
  0x27   : > { %p572_p7 = pnand %p571_p5, %p565_p12 }
  0x29   : > { %575 = shalt.err (!%p572_p7)
}
  0x2a   : > { %s645_s21 = smov 128   ;;  %s646_s22 = smov 8  }
  0x2b   : > { %503 = dma.hbm_to_vmem [thread:$0]  (!%p727_p13), %s723_s25, 16384, %s731_s27, %s733_s29, %s645_s21, %s645_s21, %s646_s22  }
  0x2c   : > { %p486_p9 = scmp.ge.s32.totalorder %s642_s9, 1  ;;  %p106_p1 = scmp.lt.s32.totalorder %s642_s9, 3 }
  0x2e   : > { %p107_p3 = pnand %p486_p9, %p106_p1 }
  0x2f   : > { %s764_s23 = sand.u32 (!%p107_p3), 1, %s634_s7  }
  0x30   : > { %110 = sbr.rel (%p107_p3) target bundleno = 135 (0x87), region = 24  ;;  %s487_s24 = sshll.u32 (!%p107_p3), %s764_s23, 10 }
  0x31   : > { %s113_s26 = scalar_lea.sflag (!%p107_p3), [#allocation3], %s764_s23  ;;  %s768_s30 = scalar_lea.vmem (!%p107_p3), [#allocation2], %s487_s24 }
  0x37   : > { %621 = dma.done.wait (%p703_p6), %s113_s26, 16384  }
  0x38   : > { %623 = vsyncadd (%p703_p6), %s113_s26, 4294950912  ;;  %v137_v0 = vld [vmem:[%s768_s30] sm:$0xff]  ;;  %v138_v1 = vld [vmem:[%s768_s30 + $0x8] sm:$0xff]  ;;  %s777_s25 = scalar_lea.vmem [#allocation5], %s487_s24  ;;  %s495_s17 = sshll.u32 %s681_s10, 14 }
  0x39   : > { %v139_v2 = vld [vmem:[%s768_s30 + $0x10] sm:$0xff]  ;;  %265 = vst [vmem:[%s777_s25] sm:$0xff] %v137_v0  ;;  %266 = vst [vmem:[%s777_s25 + $0x8] sm:$0xff] %v138_v1  ;;  %v140_v3 = vld [vmem:[%s768_s30 + $0x18] sm:$0xff]  ;;  %s407_s27 = sshll.u32 %s777_s25, 4  ;;  %s1024_s29 = scalar_lea.hbm %s1084_s1, %s495_s17  ;;  %s1026_s27 = int_to_ptr.vmem [resolvable:$true] %s407_s27 }
  0x3a   : > { %267 = vst [vmem:[%s777_s25 + $0x10] sm:$0xff] %v139_v2  ;;  %v141_v4 = vld [vmem:[%s768_s30 + $0x20] sm:$0xff]  ;;  %v142_v5 = vld [vmem:[%s768_s30 + $0x28] sm:$0xff]  ;;  %268 = vst [vmem:[%s777_s25 + $0x18] sm:$0xff] %v140_v3  ;;  %s394_s2 = scalar_lea.sflag [#allocation4], %s764_s23  ;;  %s576_s3 = scalar_lea.vmem %s1026_s27, 16384 }
  0x3b   : > { %269 = vst [vmem:[%s777_s25 + $0x20] sm:$0xff] %v141_v4  ;;  %270 = vst [vmem:[%s777_s25 + $0x28] sm:$0xff] %v142_v5  ;;  %v143_v6 = vld [vmem:[%s768_s30 + $0x30] sm:$0xff]  ;;  %v144_v7 = vld [vmem:[%s768_s30 + $0x38] sm:$0xff]  ;;  %p577_p6 = scmp.ne.s32.totalorder %s1026_s27, %s576_s3  ;;  %p1091_p11 = scmp.ne.s32.totalorder %s1088_s18, 0 }
  0x3c   : > { %v145_v8 = vld [vmem:[%s768_s30 + $0x40] sm:$0xff]  ;;  %271 = vst [vmem:[%s777_s25 + $0x30] sm:$0xff] %v143_v6  ;;  %272 = vst [vmem:[%s777_s25 + $0x38] sm:$0xff] %v144_v7  ;;  %v146_v9 = vld [vmem:[%s768_s30 + $0x48] sm:$0xff]  ;;  %s647_s4 = smov [#allocation5]  }
  0x3d   : > { %273 = vst [vmem:[%s777_s25 + $0x40] sm:$0xff] %v145_v8  ;;  %v147_v10 = vld [vmem:[%s768_s30 + $0x50] sm:$0xff]  ;;  %v148_v11 = vld [vmem:[%s768_s30 + $0x58] sm:$0xff]  ;;  %274 = vst [vmem:[%s777_s25 + $0x48] sm:$0xff] %v146_v9  ;;  %p578_p12 = pnand %p577_p6, %p1091_p11  ;;  %s580_s5 = sshll.u32 %s647_s4, 4  ;;  %s581_s5 = int_to_ptr.vmem [resolvable:$false] %s580_s5 }
  0x3e   : > { %275 = vst [vmem:[%s777_s25 + $0x50] sm:$0xff] %v147_v10  ;;  %276 = vst [vmem:[%s777_s25 + $0x58] sm:$0xff] %v148_v11  ;;  %v149_v12 = vld [vmem:[%s768_s30 + $0x60] sm:$0xff]  ;;  %v150_v13 = vld [vmem:[%s768_s30 + $0x68] sm:$0xff]  ;;  %s582_s11 = scalar_lea.vmem %s581_s5, 32768  ;;  %p583_p8 = scmp.lt.s32.totalorder %s1026_s27, %s581_s5 }
  0x3f   : > { %v151_v14 = vld [vmem:[%s768_s30 + $0x70] sm:$0xff]  ;;  %277 = vst [vmem:[%s777_s25 + $0x60] sm:$0xff] %v149_v12  ;;  %278 = vst [vmem:[%s777_s25 + $0x68] sm:$0xff] %v150_v13  ;;  %v152_v15 = vld [vmem:[%s768_s30 + $0x78] sm:$0xff]  ;;  %p579_p13 = pneg %p578_p12  ;;  %p584_p10 = scmp.lt.s32.totalorder %s582_s11, %s576_s3 }
  0x40   : > { %279 = vst [vmem:[%s777_s25 + $0x70] sm:$0xff] %v151_v14  ;;  %v153_v16 = vld [vmem:[%s768_s30 + $0x80] sm:$0xff]  ;;  %v154_v17 = vld [vmem:[%s768_s30 + $0x88] sm:$0xff]  ;;  %280 = vst [vmem:[%s777_s25 + $0x78] sm:$0xff] %v152_v15 }
  0x41   : > { %281 = vst [vmem:[%s777_s25 + $0x80] sm:$0xff] %v153_v16  ;;  %282 = vst [vmem:[%s777_s25 + $0x88] sm:$0xff] %v154_v17  ;;  %v155_v18 = vld [vmem:[%s768_s30 + $0x90] sm:$0xff]  ;;  %v156_v19 = vld [vmem:[%s768_s30 + $0x98] sm:$0xff]  ;;  %p585_p0 = por %p584_p10, %p583_p8 }
  0x42   : > { %v157_v20 = vld [vmem:[%s768_s30 + $0xa0] sm:$0xff]  ;;  %283 = vst [vmem:[%s777_s25 + $0x90] sm:$0xff] %v155_v18  ;;  %284 = vst [vmem:[%s777_s25 + $0x98] sm:$0xff] %v156_v19  ;;  %v158_v21 = vld [vmem:[%s768_s30 + $0xa8] sm:$0xff] }
  0x43   : > { %285 = vst [vmem:[%s777_s25 + $0xa0] sm:$0xff] %v157_v20  ;;  %v159_v22 = vld [vmem:[%s768_s30 + $0xb0] sm:$0xff]  ;;  %v160_v23 = vld [vmem:[%s768_s30 + $0xb8] sm:$0xff]  ;;  %286 = vst [vmem:[%s777_s25 + $0xa8] sm:$0xff] %v158_v21  ;;  %p586_p2 = pnand %p585_p0, %p579_p13 }
  0x44   : > { %287 = vst [vmem:[%s777_s25 + $0xb0] sm:$0xff] %v159_v22  ;;  %288 = vst [vmem:[%s777_s25 + $0xb8] sm:$0xff] %v160_v23  ;;  %v161_v24 = vld [vmem:[%s768_s30 + $0xc0] sm:$0xff]  ;;  %v162_v25 = vld [vmem:[%s768_s30 + $0xc8] sm:$0xff] }
  0x45   : > { %v163_v26 = vld [vmem:[%s768_s30 + $0xd0] sm:$0xff]  ;;  %289 = vst [vmem:[%s777_s25 + $0xc0] sm:$0xff] %v161_v24  ;;  %290 = vst [vmem:[%s777_s25 + $0xc8] sm:$0xff] %v162_v25  ;;  %v164_v27 = vld [vmem:[%s768_s30 + $0xd8] sm:$0xff] }
  0x46   : > { %291 = vst [vmem:[%s777_s25 + $0xd0] sm:$0xff] %v163_v26  ;;  %v165_v28 = vld [vmem:[%s768_s30 + $0xe0] sm:$0xff]  ;;  %v166_v29 = vld [vmem:[%s768_s30 + $0xe8] sm:$0xff]  ;;  %292 = vst [vmem:[%s777_s25 + $0xd8] sm:$0xff] %v164_v27 }
  0x47   : > { %293 = vst [vmem:[%s777_s25 + $0xe0] sm:$0xff] %v165_v28  ;;  %294 = vst [vmem:[%s777_s25 + $0xe8] sm:$0xff] %v166_v29  ;;  %v167_v30 = vld [vmem:[%s768_s30 + $0xf0] sm:$0xff]  ;;  %v168_v31 = vld [vmem:[%s768_s30 + $0xf8] sm:$0xff] }
  0x48   : > { %v169_v32 = vld [vmem:[%s768_s30 + $0x100] sm:$0xff]  ;;  %295 = vst [vmem:[%s777_s25 + $0xf0] sm:$0xff] %v167_v30  ;;  %296 = vst [vmem:[%s777_s25 + $0xf8] sm:$0xff] %v168_v31  ;;  %v170_v33 = vld [vmem:[%s768_s30 + $0x108] sm:$0xff] }
  0x49   : > { %297 = vst [vmem:[%s777_s25 + $0x100] sm:$0xff] %v169_v32  ;;  %v171_v34 = vld [vmem:[%s768_s30 + $0x110] sm:$0xff]  ;;  %v172_v35 = vld [vmem:[%s768_s30 + $0x118] sm:$0xff]  ;;  %298 = vst [vmem:[%s777_s25 + $0x108] sm:$0xff] %v170_v33 }
  0x4a   : > { %299 = vst [vmem:[%s777_s25 + $0x110] sm:$0xff] %v171_v34  ;;  %300 = vst [vmem:[%s777_s25 + $0x118] sm:$0xff] %v172_v35  ;;  %v173_v36 = vld [vmem:[%s768_s30 + $0x120] sm:$0xff]  ;;  %v174_v37 = vld [vmem:[%s768_s30 + $0x128] sm:$0xff] }
  0x4b   : > { %v175_v38 = vld [vmem:[%s768_s30 + $0x130] sm:$0xff]  ;;  %301 = vst [vmem:[%s777_s25 + $0x120] sm:$0xff] %v173_v36  ;;  %302 = vst [vmem:[%s777_s25 + $0x128] sm:$0xff] %v174_v37  ;;  %v176_v39 = vld [vmem:[%s768_s30 + $0x138] sm:$0xff] }
  0x4c   : > { %303 = vst [vmem:[%s777_s25 + $0x130] sm:$0xff] %v175_v38  ;;  %v177_v40 = vld [vmem:[%s768_s30 + $0x140] sm:$0xff]  ;;  %v178_v41 = vld [vmem:[%s768_s30 + $0x148] sm:$0xff]  ;;  %304 = vst [vmem:[%s777_s25 + $0x138] sm:$0xff] %v176_v39 }
  0x4d   : > { %305 = vst [vmem:[%s777_s25 + $0x140] sm:$0xff] %v177_v40  ;;  %306 = vst [vmem:[%s777_s25 + $0x148] sm:$0xff] %v178_v41  ;;  %v179_v42 = vld [vmem:[%s768_s30 + $0x150] sm:$0xff]  ;;  %v180_v43 = vld [vmem:[%s768_s30 + $0x158] sm:$0xff] }
  0x4e   : > { %v181_v44 = vld [vmem:[%s768_s30 + $0x160] sm:$0xff]  ;;  %307 = vst [vmem:[%s777_s25 + $0x150] sm:$0xff] %v179_v42  ;;  %308 = vst [vmem:[%s777_s25 + $0x158] sm:$0xff] %v180_v43  ;;  %v182_v45 = vld [vmem:[%s768_s30 + $0x168] sm:$0xff] }
  0x4f   : > { %309 = vst [vmem:[%s777_s25 + $0x160] sm:$0xff] %v181_v44  ;;  %v183_v46 = vld [vmem:[%s768_s30 + $0x170] sm:$0xff]  ;;  %v184_v47 = vld [vmem:[%s768_s30 + $0x178] sm:$0xff]  ;;  %310 = vst [vmem:[%s777_s25 + $0x168] sm:$0xff] %v182_v45 }
  0x50   : > { %311 = vst [vmem:[%s777_s25 + $0x170] sm:$0xff] %v183_v46  ;;  %312 = vst [vmem:[%s777_s25 + $0x178] sm:$0xff] %v184_v47  ;;  %v185_v48 = vld [vmem:[%s768_s30 + $0x180] sm:$0xff]  ;;  %v186_v49 = vld [vmem:[%s768_s30 + $0x188] sm:$0xff] }
  0x51   : > { %v187_v50 = vld [vmem:[%s768_s30 + $0x190] sm:$0xff]  ;;  %313 = vst [vmem:[%s777_s25 + $0x180] sm:$0xff] %v185_v48  ;;  %314 = vst [vmem:[%s777_s25 + $0x188] sm:$0xff] %v186_v49  ;;  %v188_v51 = vld [vmem:[%s768_s30 + $0x198] sm:$0xff] }
  0x52   : > { %315 = vst [vmem:[%s777_s25 + $0x190] sm:$0xff] %v187_v50  ;;  %v189_v52 = vld [vmem:[%s768_s30 + $0x1a0] sm:$0xff]  ;;  %v190_v53 = vld [vmem:[%s768_s30 + $0x1a8] sm:$0xff]  ;;  %316 = vst [vmem:[%s777_s25 + $0x198] sm:$0xff] %v188_v51 }
  0x53   : > { %317 = vst [vmem:[%s777_s25 + $0x1a0] sm:$0xff] %v189_v52  ;;  %318 = vst [vmem:[%s777_s25 + $0x1a8] sm:$0xff] %v190_v53  ;;  %v191_v54 = vld [vmem:[%s768_s30 + $0x1b0] sm:$0xff]  ;;  %v192_v55 = vld [vmem:[%s768_s30 + $0x1b8] sm:$0xff] }
  0x54   : > { %v193_v56 = vld [vmem:[%s768_s30 + $0x1c0] sm:$0xff]  ;;  %319 = vst [vmem:[%s777_s25 + $0x1b0] sm:$0xff] %v191_v54  ;;  %320 = vst [vmem:[%s777_s25 + $0x1b8] sm:$0xff] %v192_v55  ;;  %v194_v57 = vld [vmem:[%s768_s30 + $0x1c8] sm:$0xff] }
  0x55   : > { %321 = vst [vmem:[%s777_s25 + $0x1c0] sm:$0xff] %v193_v56  ;;  %v195_v58 = vld [vmem:[%s768_s30 + $0x1d0] sm:$0xff]  ;;  %v196_v59 = vld [vmem:[%s768_s30 + $0x1d8] sm:$0xff]  ;;  %322 = vst [vmem:[%s777_s25 + $0x1c8] sm:$0xff] %v194_v57 }
  0x56   : > { %323 = vst [vmem:[%s777_s25 + $0x1d0] sm:$0xff] %v195_v58  ;;  %324 = vst [vmem:[%s777_s25 + $0x1d8] sm:$0xff] %v196_v59  ;;  %v197_v60 = vld [vmem:[%s768_s30 + $0x1e0] sm:$0xff]  ;;  %v198_v61 = vld [vmem:[%s768_s30 + $0x1e8] sm:$0xff] }
  0x57   : > { %v199_v62 = vld [vmem:[%s768_s30 + $0x1f0] sm:$0xff]  ;;  %325 = vst [vmem:[%s777_s25 + $0x1e0] sm:$0xff] %v197_v60  ;;  %326 = vst [vmem:[%s777_s25 + $0x1e8] sm:$0xff] %v198_v61  ;;  %v200_v63 = vld [vmem:[%s768_s30 + $0x1f8] sm:$0xff] }
  0x58   : > { %327 = vst [vmem:[%s777_s25 + $0x1f0] sm:$0xff] %v199_v62  ;;  %v201_v0 = vld [vmem:[%s768_s30 + $0x200] sm:$0xff]  ;;  %v202_v1 = vld [vmem:[%s768_s30 + $0x208] sm:$0xff]  ;;  %328 = vst [vmem:[%s777_s25 + $0x1f8] sm:$0xff] %v200_v63 }
  0x59   : > { %329 = vst [vmem:[%s777_s25 + $0x200] sm:$0xff] %v201_v0  ;;  %330 = vst [vmem:[%s777_s25 + $0x208] sm:$0xff] %v202_v1  ;;  %v203_v2 = vld [vmem:[%s768_s30 + $0x210] sm:$0xff]  ;;  %v204_v3 = vld [vmem:[%s768_s30 + $0x218] sm:$0xff] }
  0x5a   : > { %v205_v4 = vld [vmem:[%s768_s30 + $0x220] sm:$0xff]  ;;  %331 = vst [vmem:[%s777_s25 + $0x210] sm:$0xff] %v203_v2  ;;  %332 = vst [vmem:[%s777_s25 + $0x218] sm:$0xff] %v204_v3  ;;  %v206_v5 = vld [vmem:[%s768_s30 + $0x228] sm:$0xff] }
  0x5b   : > { %333 = vst [vmem:[%s777_s25 + $0x220] sm:$0xff] %v205_v4  ;;  %v207_v6 = vld [vmem:[%s768_s30 + $0x230] sm:$0xff]  ;;  %v208_v7 = vld [vmem:[%s768_s30 + $0x238] sm:$0xff]  ;;  %334 = vst [vmem:[%s777_s25 + $0x228] sm:$0xff] %v206_v5 }
  0x5c   : > { %335 = vst [vmem:[%s777_s25 + $0x230] sm:$0xff] %v207_v6  ;;  %336 = vst [vmem:[%s777_s25 + $0x238] sm:$0xff] %v208_v7  ;;  %v209_v8 = vld [vmem:[%s768_s30 + $0x240] sm:$0xff]  ;;  %v210_v9 = vld [vmem:[%s768_s30 + $0x248] sm:$0xff] }
  0x5d   : > { %v211_v10 = vld [vmem:[%s768_s30 + $0x250] sm:$0xff]  ;;  %337 = vst [vmem:[%s777_s25 + $0x240] sm:$0xff] %v209_v8  ;;  %338 = vst [vmem:[%s777_s25 + $0x248] sm:$0xff] %v210_v9  ;;  %v212_v11 = vld [vmem:[%s768_s30 + $0x258] sm:$0xff] }
  0x5e   : > { %339 = vst [vmem:[%s777_s25 + $0x250] sm:$0xff] %v211_v10  ;;  %v213_v12 = vld [vmem:[%s768_s30 + $0x260] sm:$0xff]  ;;  %v214_v13 = vld [vmem:[%s768_s30 + $0x268] sm:$0xff]  ;;  %340 = vst [vmem:[%s777_s25 + $0x258] sm:$0xff] %v212_v11 }
  0x5f   : > { %341 = vst [vmem:[%s777_s25 + $0x260] sm:$0xff] %v213_v12  ;;  %342 = vst [vmem:[%s777_s25 + $0x268] sm:$0xff] %v214_v13  ;;  %v215_v14 = vld [vmem:[%s768_s30 + $0x270] sm:$0xff]  ;;  %v216_v15 = vld [vmem:[%s768_s30 + $0x278] sm:$0xff] }
  0x60   : > { %v217_v16 = vld [vmem:[%s768_s30 + $0x280] sm:$0xff]  ;;  %343 = vst [vmem:[%s777_s25 + $0x270] sm:$0xff] %v215_v14  ;;  %344 = vst [vmem:[%s777_s25 + $0x278] sm:$0xff] %v216_v15  ;;  %v218_v17 = vld [vmem:[%s768_s30 + $0x288] sm:$0xff] }
  0x61   : > { %345 = vst [vmem:[%s777_s25 + $0x280] sm:$0xff] %v217_v16  ;;  %v219_v18 = vld [vmem:[%s768_s30 + $0x290] sm:$0xff]  ;;  %v220_v19 = vld [vmem:[%s768_s30 + $0x298] sm:$0xff]  ;;  %346 = vst [vmem:[%s777_s25 + $0x288] sm:$0xff] %v218_v17 }
  0x62   : > { %347 = vst [vmem:[%s777_s25 + $0x290] sm:$0xff] %v219_v18  ;;  %348 = vst [vmem:[%s777_s25 + $0x298] sm:$0xff] %v220_v19  ;;  %v221_v20 = vld [vmem:[%s768_s30 + $0x2a0] sm:$0xff]  ;;  %v222_v21 = vld [vmem:[%s768_s30 + $0x2a8] sm:$0xff] }
  0x63   : > { %v223_v22 = vld [vmem:[%s768_s30 + $0x2b0] sm:$0xff]  ;;  %349 = vst [vmem:[%s777_s25 + $0x2a0] sm:$0xff] %v221_v20  ;;  %350 = vst [vmem:[%s777_s25 + $0x2a8] sm:$0xff] %v222_v21  ;;  %v224_v23 = vld [vmem:[%s768_s30 + $0x2b8] sm:$0xff] }
  0x64   : > { %351 = vst [vmem:[%s777_s25 + $0x2b0] sm:$0xff] %v223_v22  ;;  %v225_v24 = vld [vmem:[%s768_s30 + $0x2c0] sm:$0xff]  ;;  %v226_v25 = vld [vmem:[%s768_s30 + $0x2c8] sm:$0xff]  ;;  %352 = vst [vmem:[%s777_s25 + $0x2b8] sm:$0xff] %v224_v23 }
  0x65   : > { %353 = vst [vmem:[%s777_s25 + $0x2c0] sm:$0xff] %v225_v24  ;;  %354 = vst [vmem:[%s777_s25 + $0x2c8] sm:$0xff] %v226_v25  ;;  %v227_v26 = vld [vmem:[%s768_s30 + $0x2d0] sm:$0xff]  ;;  %v228_v27 = vld [vmem:[%s768_s30 + $0x2d8] sm:$0xff] }
  0x66   : > { %v229_v28 = vld [vmem:[%s768_s30 + $0x2e0] sm:$0xff]  ;;  %355 = vst [vmem:[%s777_s25 + $0x2d0] sm:$0xff] %v227_v26  ;;  %356 = vst [vmem:[%s777_s25 + $0x2d8] sm:$0xff] %v228_v27  ;;  %v230_v29 = vld [vmem:[%s768_s30 + $0x2e8] sm:$0xff] }
  0x67   : > { %357 = vst [vmem:[%s777_s25 + $0x2e0] sm:$0xff] %v229_v28  ;;  %v231_v30 = vld [vmem:[%s768_s30 + $0x2f0] sm:$0xff]  ;;  %v232_v31 = vld [vmem:[%s768_s30 + $0x2f8] sm:$0xff]  ;;  %358 = vst [vmem:[%s777_s25 + $0x2e8] sm:$0xff] %v230_v29 }
  0x68   : > { %359 = vst [vmem:[%s777_s25 + $0x2f0] sm:$0xff] %v231_v30  ;;  %360 = vst [vmem:[%s777_s25 + $0x2f8] sm:$0xff] %v232_v31  ;;  %v233_v32 = vld [vmem:[%s768_s30 + $0x300] sm:$0xff]  ;;  %v234_v33 = vld [vmem:[%s768_s30 + $0x308] sm:$0xff] }
  0x69   : > { %v235_v34 = vld [vmem:[%s768_s30 + $0x310] sm:$0xff]  ;;  %361 = vst [vmem:[%s777_s25 + $0x300] sm:$0xff] %v233_v32  ;;  %362 = vst [vmem:[%s777_s25 + $0x308] sm:$0xff] %v234_v33  ;;  %v236_v35 = vld [vmem:[%s768_s30 + $0x318] sm:$0xff] }
  0x6a   : > { %363 = vst [vmem:[%s777_s25 + $0x310] sm:$0xff] %v235_v34  ;;  %v237_v36 = vld [vmem:[%s768_s30 + $0x320] sm:$0xff]  ;;  %v238_v37 = vld [vmem:[%s768_s30 + $0x328] sm:$0xff]  ;;  %364 = vst [vmem:[%s777_s25 + $0x318] sm:$0xff] %v236_v35 }
  0x6b   : > { %365 = vst [vmem:[%s777_s25 + $0x320] sm:$0xff] %v237_v36  ;;  %366 = vst [vmem:[%s777_s25 + $0x328] sm:$0xff] %v238_v37  ;;  %v239_v38 = vld [vmem:[%s768_s30 + $0x330] sm:$0xff]  ;;  %v240_v39 = vld [vmem:[%s768_s30 + $0x338] sm:$0xff] }
  0x6c   : > { %v241_v40 = vld [vmem:[%s768_s30 + $0x340] sm:$0xff]  ;;  %367 = vst [vmem:[%s777_s25 + $0x330] sm:$0xff] %v239_v38  ;;  %368 = vst [vmem:[%s777_s25 + $0x338] sm:$0xff] %v240_v39  ;;  %v242_v41 = vld [vmem:[%s768_s30 + $0x348] sm:$0xff] }
  0x6d   : > { %369 = vst [vmem:[%s777_s25 + $0x340] sm:$0xff] %v241_v40  ;;  %v243_v42 = vld [vmem:[%s768_s30 + $0x350] sm:$0xff]  ;;  %v244_v43 = vld [vmem:[%s768_s30 + $0x358] sm:$0xff]  ;;  %370 = vst [vmem:[%s777_s25 + $0x348] sm:$0xff] %v242_v41 }
  0x6e   : > { %371 = vst [vmem:[%s777_s25 + $0x350] sm:$0xff] %v243_v42  ;;  %372 = vst [vmem:[%s777_s25 + $0x358] sm:$0xff] %v244_v43  ;;  %v245_v44 = vld [vmem:[%s768_s30 + $0x360] sm:$0xff]  ;;  %v246_v45 = vld [vmem:[%s768_s30 + $0x368] sm:$0xff] }
  0x6f   : > { %v247_v46 = vld [vmem:[%s768_s30 + $0x370] sm:$0xff]  ;;  %373 = vst [vmem:[%s777_s25 + $0x360] sm:$0xff] %v245_v44  ;;  %374 = vst [vmem:[%s777_s25 + $0x368] sm:$0xff] %v246_v45  ;;  %v248_v47 = vld [vmem:[%s768_s30 + $0x378] sm:$0xff] }
  0x70   : > { %375 = vst [vmem:[%s777_s25 + $0x370] sm:$0xff] %v247_v46  ;;  %v249_v48 = vld [vmem:[%s768_s30 + $0x380] sm:$0xff]  ;;  %v250_v49 = vld [vmem:[%s768_s30 + $0x388] sm:$0xff]  ;;  %376 = vst [vmem:[%s777_s25 + $0x378] sm:$0xff] %v248_v47 }
  0x71   : > { %377 = vst [vmem:[%s777_s25 + $0x380] sm:$0xff] %v249_v48  ;;  %378 = vst [vmem:[%s777_s25 + $0x388] sm:$0xff] %v250_v49  ;;  %v251_v50 = vld [vmem:[%s768_s30 + $0x390] sm:$0xff]  ;;  %v252_v51 = vld [vmem:[%s768_s30 + $0x398] sm:$0xff] }
  0x72   : > { %v253_v52 = vld [vmem:[%s768_s30 + $0x3a0] sm:$0xff]  ;;  %379 = vst [vmem:[%s777_s25 + $0x390] sm:$0xff] %v251_v50  ;;  %380 = vst [vmem:[%s777_s25 + $0x398] sm:$0xff] %v252_v51  ;;  %v254_v53 = vld [vmem:[%s768_s30 + $0x3a8] sm:$0xff] }
  0x73   : > { %381 = vst [vmem:[%s777_s25 + $0x3a0] sm:$0xff] %v253_v52  ;;  %v255_v54 = vld [vmem:[%s768_s30 + $0x3b0] sm:$0xff]  ;;  %v256_v55 = vld [vmem:[%s768_s30 + $0x3b8] sm:$0xff]  ;;  %382 = vst [vmem:[%s777_s25 + $0x3a8] sm:$0xff] %v254_v53 }
  0x74   : > { %383 = vst [vmem:[%s777_s25 + $0x3b0] sm:$0xff] %v255_v54  ;;  %384 = vst [vmem:[%s777_s25 + $0x3b8] sm:$0xff] %v256_v55  ;;  %v257_v56 = vld [vmem:[%s768_s30 + $0x3c0] sm:$0xff]  ;;  %v258_v57 = vld [vmem:[%s768_s30 + $0x3c8] sm:$0xff] }
  0x75   : > { %v259_v58 = vld [vmem:[%s768_s30 + $0x3d0] sm:$0xff]  ;;  %385 = vst [vmem:[%s777_s25 + $0x3c0] sm:$0xff] %v257_v56  ;;  %386 = vst [vmem:[%s777_s25 + $0x3c8] sm:$0xff] %v258_v57  ;;  %v260_v59 = vld [vmem:[%s768_s30 + $0x3d8] sm:$0xff] }
  0x76   : > { %387 = vst [vmem:[%s777_s25 + $0x3d0] sm:$0xff] %v259_v58  ;;  %v261_v60 = vld [vmem:[%s768_s30 + $0x3e0] sm:$0xff]  ;;  %v262_v61 = vld [vmem:[%s768_s30 + $0x3e8] sm:$0xff]  ;;  %388 = vst [vmem:[%s777_s25 + $0x3d8] sm:$0xff] %v260_v59 }
  0x77   : > { %389 = vst [vmem:[%s777_s25 + $0x3e0] sm:$0xff] %v261_v60  ;;  %390 = vst [vmem:[%s777_s25 + $0x3e8] sm:$0xff] %v262_v61  ;;  %v263_v62 = vld [vmem:[%s768_s30 + $0x3f0] sm:$0xff]  ;;  %v264_v63 = vld [vmem:[%s768_s30 + $0x3f8] sm:$0xff] }
  0x78   : > { %391 = vst [vmem:[%s777_s25 + $0x3f0] sm:$0xff] %v263_v62  ;;  %392 = vst [vmem:[%s777_s25 + $0x3f8] sm:$0xff] %v264_v63 }
  0x79   : > { %589 = shalt.err (!%p586_p2)
}
  0x7a   : > { %s590_s13 = scalar_lea.hbm %s1024_s29, 16384  ;;  %s594_s20 = scalar_lea.hbm %s1084_s1, 32768 }
  0x7b   : > { %p591_p4 = scmp.ne.s32.totalorder %s1024_s29, %s590_s13  ;;  %p595_p9 = scmp.lt.u32.totalorder %s1024_s29, %s1084_s1 }
  0x7c   : > { %p596_p1 = scmp.lt.u32.totalorder %s594_s20, %s590_s13  ;;  %p598_p6 = scmp.lt.u32.totalorder %s590_s13, %s1024_s29 }
  0x7d   : > { %p592_p5 = pnand %p591_p4, %p1091_p11 }
  0x7e   : > { %p597_p3 = por %p596_p1, %p595_p9 }
  0x7f   : > { %p593_p7 = pneg %p592_p5 }
  0x80   : > { %p599_p12 = por %p598_p6, %p597_p3 }
  0x82   : > { %p600_p13 = pnand %p599_p12, %p593_p7 }
  0x84   : > { %603 = shalt.err (!%p600_p13)
}
  0x85   : > { %s648_s24 = smov 128   ;;  %s649_s26 = smov 8  }
  0x86   : > { %498 = dma.vmem_to_hbm [thread:$0]  (%p1091_p11), %s1026_s27, 16384, %s1024_s29, %s394_s2, %s648_s24, %s648_s24, %s649_s26  }
  0x87 PF: > { %s422_s30 = sand.u32 1, %s630_s6   ;;  %p1092_p8 = scmp.ne.s32.totalorder %s1089_s19, 0 }
  0x88   : > { %p1093_p10 = scmp.ge.s32.totalorder %s642_s9, 2  ;;  %s423_s25 = scalar_lea.sflag [#allocation4], %s422_s30 }
  0x8a   : > { %p505_p0 = pnand %p1093_p10, %p1092_p8 }
  0x8c   : > { %625 = dma.done.wait (!%p505_p0), %s423_s25, 16384  }
  0x8d   : > { %627 = vsyncadd (!%p505_p0), %s423_s25, 4294950912  ;;  %p14_p2 = scmp.ge.s32.totalorder %s685_s12, 4   ;;  %s1094_s6 = smov %s634_s7 }
  0x8e   : > { %s1095_s7 = smov %s638_s8  ;;  %s1096_s8 = smov %s697_s15 }
  0x8f   : > { %s1097_s9 = smov %s685_s12  ;;  %16 = sbr.rel (!%p14_p2) target bundleno = 5 (0x5), region = 69 }
  0x96   :  { %428 = vsyncpa [#allocation3], 1 }
  0x97   :  { %430 = vsyncpa [#allocation3 + $0x1], 1 }
  0x98   :  { %431 = vsyncpa [#allocation4], 1 }
  0x99   :  { %433 = vsyncpa [#allocation4 + $0x1], 1 }

</bundles_post_ra>
